<compile_context>
chip_gen: v5e
topology: v5e:2x2
jax: 0.10.0
libtpu: 0.0.40
codegen_flags: <defaults>
</compile_context>

<pallas_src>
import functools

import jax
import jax.numpy as jnp
import numpy as np
from jax.experimental import pallas as pl
from jax.experimental.pallas import tpu as pltpu


def _word_proj_kernel(word_ref, w2t_ref, wd_ref):
    # fc_2 (no bias): (K, Dw) @ (Dw, D) -> (K, D), computed once per forward.
    wd_ref[...] = jnp.dot(word_ref[...], w2t_ref[...],
                          preferred_element_type=jnp.float32)


def _logits_kernel(x_ref, wd_ref, w1t_ref, w3a_ref, bias_ref, out_ref, *, tanh_dtype):
    # x_ref:   (tile_hw, C)  raw-memory rows of the NCHW map (per batch, per tile)
    # wd_ref:  (K, D)        hoisted fc_2 projection (grid invariant)
    # out_ref: (tile_hw, K)  logits tile
    # bias_ref: (1, 1) in SMEM (fused fc_3/fc_a bias)
    f1 = jnp.dot(x_ref[...], w1t_ref[...],
                 preferred_element_type=jnp.float32)                  # MXU: (tile_hw, D)
    gate = f1[:, None, :] * wd_ref[...][None, :, :]                   # VPU: (tile_hw, K, D)
    t = jnp.tanh(gate.astype(tanh_dtype)).astype(jnp.float32)         # EUP (the bottleneck)
    # folded fc_3 -> fc_a: contract over D against the (1, D) vector w3a.
    logits = jnp.sum(t * w3a_ref[...][None, :, :], axis=-1)           # VPU mul + XLU reduce
    out_ref[...] = logits + bias_ref[0, 0]


def _softmax_kernel(lg_ref, out_ref):
    lg = lg_ref[...]                                   # (K, HW) scrambled view
    m = jnp.max(lg, axis=-1, keepdims=True)
    e = jnp.exp(lg - m)
    out_ref[...] = e / jnp.sum(e, axis=-1, keepdims=True)


def _weighted_sum_kernel(coeff_ref, x_ref, out_ref):
    # coeff: (HW, K), x: (HW, C)  ->  out: (K, C) = coeff^T @ x
    out_ref[...] = jax.lax.dot_general(
        coeff_ref[...], x_ref[...],
        dimension_numbers=(((0,), (0,)), ((), ())),
        preferred_element_type=jnp.float32)


def _pick_tile_hw(hw, num_classes, inter_dim, chain_budget_bytes=4 * 1024 * 1024):
    # The tanh chain materializes ~3 f32 arrays of (tile_hw, K, D); keep them within
    # a few MB so the chain never spills (K=80, D=1024 realistic -> tile_hw = 8).
    t = chain_budget_bytes // (3 * num_classes * inter_dim * 4)
    t = (t // 8) * 8
    t = max(8, min(t, 128))
    hw_pad8 = ((hw + 7) // 8) * 8
    return int(min(t, hw_pad8))


def semantic_forward(img_feature_map, word_embedding, params, tile_hw=None,
                     tanh_dtype=jnp.float32, vmem_limit_bytes=32 * 1024 * 1024):
    B, C, H, W = img_feature_map.shape
    K, Dw = word_embedding.shape
    D = params["W1"].shape[0]
    HW = H * W

    if tile_hw is None:
        tile_hw = _pick_tile_hw(HW, K, D)
    tile_hw = int(tile_hw)
    assert tile_hw % 8 == 0, "tile_hw must be a multiple of 8"
    HW_pad = ((HW + tile_hw - 1) // tile_hw) * tile_hw
    n_hw = HW_pad // tile_hw

    # Glue: raw memory reinterpretation, identical to torch .view(-1, C) grouped per batch.
    x = img_feature_map.reshape(B, HW, C).astype(jnp.float32)
    word = word_embedding.astype(jnp.float32)

    # Parameter setup (pre-transpose so kernels do plain x @ Wt).
    w1t = params["W1"].T.astype(jnp.float32)          # (C, D)
    w2t = params["W2"].T.astype(jnp.float32)          # (Dw, D)
    # Algebraic fold of fc_3 -> fc_a:
    #   logits = t @ W3.T @ Wa.T + (b3 @ Wa.T + ba) = t @ w3a^T + fused_bias
    w3a = (params["Wa"] @ params["W3"]).reshape(1, D).astype(jnp.float32)        # (1, D)
    fused_bias = (params["b3"] @ params["Wa"].T
                  + params["ba"]).reshape(1, 1).astype(jnp.float32)              # (1, 1)

    # --- Kernel 0: hoisted fc_2 word projection (batch/grid invariant) -----------
    wd = pl.pallas_call(
        _word_proj_kernel,
        out_shape=jax.ShapeDtypeStruct((K, D), jnp.float32),
    )(word, w2t)

    # Pad HW rows up to a multiple of tile_hw (zero rows -> logits later discarded).
    x_pad = x if HW_pad == HW else jnp.pad(x, ((0, 0), (0, HW_pad - HW), (0, 0)))

    def full(shape):
        return pl.BlockSpec(shape, lambda *_: (0,) * len(shape))

    cost = pl.CostEstimate(
        flops=int(2 * B * HW_pad * C * D + 3 * B * HW_pad * K * D),
        transcendentals=int(B * HW_pad * K * D),
        bytes_accessed=int(4 * (B * HW_pad * C + K * D + C * D + D + 1
                                + B * HW_pad * K)),
    )

    # --- Kernel 1: per-(batch, hw-tile) logits, fully parallel grid ---------------
    logits = pl.pallas_call(
        functools.partial(_logits_kernel, tanh_dtype=tanh_dtype),
        out_shape=jax.ShapeDtypeStruct((B, HW_pad, K), jnp.float32),
        grid=(B, n_hw),
        in_specs=[
            pl.BlockSpec((None, tile_hw, C), lambda b, t: (b, t, 0)),
            full((K, D)),
            full((C, D)),
            full((1, D)),
            pl.BlockSpec(memory_space=pltpu.MemorySpace.SMEM),
        ],
        out_specs=pl.BlockSpec((None, tile_hw, K), lambda b, t: (b, t, 0)),
        compiler_params=pltpu.CompilerParams(
            dimension_semantics=("parallel", "parallel"),
            vmem_limit_bytes=vmem_limit_bytes),
        cost_estimate=cost,
    )(x_pad, wd, w1t, w3a, fused_bias)

    # Glue: drop padded rows, then torch coefficient.view(B, K, -1) -- a raw
    # row-major reinterpretation (no data movement).
    lg = logits[:, :HW, :].reshape(B, K, HW)

    # --- Kernel 2: softmax over dim 2, per-batch blocks ---------------------------
    coeff = pl.pallas_call(
        _softmax_kernel,
        out_shape=jax.ShapeDtypeStruct((B, K, HW), jnp.float32),
        grid=(B,),
        in_specs=[pl.BlockSpec((None, K, HW), lambda b: (b, 0, 0))],
        out_specs=pl.BlockSpec((None, K, HW), lambda b: (b, 0, 0)),
        compiler_params=pltpu.CompilerParams(dimension_semantics=("parallel",)),
    )(lg)

    # Glue: torch coefficient.view(B, H, W, K), spatial flattened (raw reinterpretation).
    coeff_hwk = coeff.reshape(B, HW, K)

    # --- Kernel 3: weighted spatial reduction -> (B, K, C) ------------------------
    out = pl.pallas_call(
        _weighted_sum_kernel,
        out_shape=jax.ShapeDtypeStruct((B, K, C), jnp.float32),
        grid=(B,),
        in_specs=[
            pl.BlockSpec((None, HW, K), lambda b: (b, 0, 0)),
            pl.BlockSpec((None, HW, C), lambda b: (b, 0, 0)),
        ],
        out_specs=pl.BlockSpec((None, K, C), lambda b: (b, 0, 0)),
        compiler_params=pltpu.CompilerParams(dimension_semantics=("parallel",)),
    )(coeff_hwk, x)
    return out


def semantic_reference(img, word, params):
    """Pure-JAX mirror of the PyTorch forward (unfolded fc_3/fc_a; same raw .view
    reinterpretations). Validates both the semantics and the W3/Wa fold."""
    B, C, H, W = img.shape
    K = word.shape[0]
    D = params["W1"].shape[0]
    x = img.reshape(-1, C)
    f_wh = x @ params["W1"].T                           # (N, D)
    f_wd = word @ params["W2"].T                        # (K, D)
    t = jnp.tanh(f_wh[:, None, :] * f_wd[None, :, :])   # (N, K, D)
    lb = t.reshape(-1, D) @ params["W3"].T + params["b3"]
    coeff = lb @ params["Wa"].T + params["ba"]          # (N*K, 1)
    coeff = coeff.reshape(B, K, -1)
    coeff = jax.nn.softmax(coeff, axis=2)
    coeff = coeff.reshape(B, H, W, K)
    imgv = img.reshape(B, H, W, C)
    prod = imgv[:, :, :, None, :] * coeff[:, :, :, :, None]
    return prod.sum(axis=(1, 2))


if __name__ == "__main__":
    # Small shapes consistent with the module.
    B, K, C, Dw, D = 2, 8, 16, 32, 128
    key = jax.random.PRNGKey(0)
    k_img, k_word, k1, k2, k3, kb3, ka, kba, k_img2 = jax.random.split(key, 9)

    word = jax.random.normal(k_word, (K, Dw), dtype=jnp.float32)
    params = {
        "W1": jax.random.normal(k1, (D, C), jnp.float32) / np.sqrt(C),      # fc_1, bias=False
        "W2": jax.random.normal(k2, (D, Dw), jnp.float32) / np.sqrt(Dw),    # fc_2, bias=False
        "W3": jax.random.normal(k3, (D, D), jnp.float32) / np.sqrt(D),      # fc_3
        "b3": jax.random.normal(kb3, (D,), jnp.float32) / np.sqrt(D),
        "Wa": jax.random.normal(ka, (1, D), jnp.float32) / np.sqrt(D),      # fc_a
        "ba": jax.random.normal(kba, (1,), jnp.float32) / np.sqrt(D),
    }

    # Case 1: 4x4 feature map, explicit tile_hw=8 -> 2 hw tiles per image.
    img = jax.random.normal(k_img, (B, C, 4, 4), dtype=jnp.float32)
    out = semantic_forward(img, word, params, tile_hw=8)
    jax.block_until_ready(out)
    ref = semantic_reference(img, word, params)
    np.testing.assert_allclose(np.asarray(out), np.asarray(ref), rtol=1e-3, atol=1e-3)

    # Case 2: 3x3 feature map (HW=9, no multiple-of-8 divisor) exercises the
    # padding path that realistic SSGRL sizes (7x7=49, 14x14=196) also hit.
    img2 = jax.random.normal(k_img2, (B, C, 3, 3), dtype=jnp.float32)
    out2 = semantic_forward(img2, word, params)
    jax.block_until_ready(out2)
    ref2 = semantic_reference(img2, word, params)
    np.testing.assert_allclose(np.asarray(out2), np.asarray(ref2), rtol=1e-3, atol=1e-3)

    print("KERNEL_OK")
</pallas_src>

<mosaic_0001>
module attributes {stable_mosaic.version = 11 : i64} {
  func.func @_word_proj_kernel(%arg0: memref<8x32xf32, #tpu.memory_space<vmem>>, %arg1: memref<32x128xf32, #tpu.memory_space<vmem>>, %arg2: memref<8x128xf32, #tpu.memory_space<vmem>>) attributes {dimension_semantics = [], scalar_prefetch = 0 : i64, scratch_operands = 0 : i64, tpu.core_type = #tpu.core_type<tc>} {
    %c0 = arith.constant 0 : index
    %c0_0 = arith.constant 0 : index
    %0 = vector.load %arg0[%c0, %c0_0] : memref<8x32xf32, #tpu.memory_space<vmem>>, vector<8x32xf32>
    %c0_1 = arith.constant 0 : index
    %c0_2 = arith.constant 0 : index
    %1 = vector.load %arg1[%c0_1, %c0_2] : memref<32x128xf32, #tpu.memory_space<vmem>>, vector<32x128xf32>
    %cst = arith.constant dense<0.000000e+00> : vector<8x128xf32>
    %2 = tpu.matmul %0, %1, %cst {dimension_numbers = #tpu.dot_dimension_numbers<[1], [0], [0], [1], [0, 0, 1, 1], [], []>} : vector<8x32xf32>, vector<32x128xf32>, vector<8x128xf32> -> vector<8x128xf32>
    %c0_3 = arith.constant 0 : index
    %c0_4 = arith.constant 0 : index
    %3 = vector.load %arg2[%c0_3, %c0_4] : memref<8x128xf32, #tpu.memory_space<vmem>>, vector<8x128xf32>
    tpu.vector_store %arg2[%c0_3, %c0_4], %2 {strides = array<i32>} : memref<8x128xf32, #tpu.memory_space<vmem>>, vector<8x128xf32>,
    return
  }
}

</mosaic_0001>

<bundles_post_ra>
// kernel: tpu_custom_call.1
= control target key start
LH: loop header
LB: loop body
LE: loop exit
PB: predicated region body
PF: predicated region fallthrough
CT: control target
= control target key end

     0   :  { %7 = vsyncpa [#allocation3], 0  ;;  %s203_s0 = inlined_call_operand.hbm [shape: f32[8,32], index: 0, kind: input, shape index: {}]   ;;  %s204_s1 = inlined_call_operand.hbm [shape: f32[32,128], index: 1, kind: input, shape index: {}]   ;;  %s205_s2 = inlined_call_operand.hbm [shape: f32[8,128], index: 2, kind: output, shape index: {}]  }
   0x1   :  { %8 = vsyncpa [#allocation6], 0 }
   0x2   :  { %9 = vsyncpa [#allocation4], 0  ;;  %s15_s11 = sshll.u32 %s203_s0, 4  ;;  %s174_s12 = smov [#allocation2]   ;;  %s16_s11 = int_to_ptr.hbm [resolvable:$true] %s15_s11 }
   0x3   :  { %s17_s13 = sshll.u32 %s174_s12, 4  ;;  %s25_s16 = sshll.u32 %s204_s1, 4  ;;  %s18_s13 = int_to_ptr.vmem [resolvable:$true] %s17_s13  ;;  %s26_s16 = int_to_ptr.hbm [resolvable:$true] %s25_s16 }
   0x4   :  { %20 = dma.hbm_to_vmem [thread:$0]  %s16_s11, 128, %s18_s13, [#allocation3]  }
   0x5   :  { %s175_s17 = smov [#allocation5]   ;;  %s176_s19 = smov 128  }
   0x6   :  { %s27_s18 = sshll.u32 %s175_s17, 4  ;;  %s177_s20 = smov 8   ;;  %s28_s18 = int_to_ptr.vmem [resolvable:$true] %s27_s18 }
   0x7   :  { %33 = dma.hbm_to_vmem [thread:$0]  %s26_s16, 512, %s28_s18, [#allocation6], %s176_s19, %s176_s19, %s177_s20  }
   0x8   :  { %168 = dma.done.wait [#allocation3], 128  }
   0x9   :  { %169 = vsyncadd [#allocation3], 4294967168 }
   0xa   :  { %170 = dma.done.wait [#allocation6], 512  }
   0xb   :  { %171 = vsyncadd [#allocation6], 4294966784  ;;  %v46_v0 = vld [vmem:[#allocation5 + $0x18] sm:$0xff]  ;;  %v45_v1 = vld [vmem:[#allocation5 + $0x10] sm:$0xff]  ;;  %vm47_vm0 = vcmask 261120   ;;  %s178_s0 = smov [#allocation7]  }
   0xc   :  { %63 = vmatpush.msra.mxu0 %v46_v0  ;;  %v44_v2 = vld [vmem:[#allocation5 + $0x8] sm:$0xff]  ;;  %v43_v3 = vld [vmem:[#allocation5] sm:$0xff]  ;;  %v42_v4 = vld [vmem:[#allocation2] sm:$0xff]  ;;  %s77_s1 = sshll.u32 %s178_s0, 4  ;;  %s79_s23 = sshll.u32 %s205_s2, 4  ;;  %s78_s1 = int_to_ptr.vmem [resolvable:$true] %s77_s1  ;;  %s80_s23 = int_to_ptr.hbm [resolvable:$true] %s79_s23 }
   0xe   :  { %64 = vmatpush.msra.mxu0 %v45_v1 }
  0x10   :  { %65 = vmatpush.msra.mxu0 %v44_v2 }
  0x12   :  { %66 = vmatpush.msra.mxu0 %v43_v3 }
  0x13   :  { %90 = vmatmul.msk.f32.vlgmr.msra.gmra.mxu0 %vm47_vm0, %v42_v4 }
  0x90   :  { %v68_v5 = vpop.f32.mrf.mxu0 }
  0x91   :  { %71 = vst [vmem:[#allocation7] sm:$0xff] %v68_v5 }
  0x92   :  { %82 = dma.vmem_to_hbm [thread:$0]  %s78_s1, 128, %s80_s23, [#allocation4]  }
  0x93   :  { %172 = dma.done.wait [#allocation4], 128  }
  0x94   :  { %173 = vsyncadd [#allocation4], 4294967168 }
  0x95   :  { %87 = vsyncpa [#allocation3], 1 }
  0x96   :  { %88 = vsyncpa [#allocation6], 1 }
  0x97   :  { %89 = vsyncpa [#allocation4], 1 }

</bundles_post_ra>
